<compile_context>
chip_gen: v6e
topology: v6e:2x2x1
jax: 0.10.0
libtpu: 0.0.40
codegen_flags: <defaults>
</compile_context>

<pallas_src>
import functools

import jax
import jax.numpy as jnp
from jax.experimental import pallas as pl
from jax.experimental.pallas import tpu as pltpu

VMEM = pltpu.MemorySpace.VMEM
SMEM = pltpu.MemorySpace.SMEM


# ----------------------------------------------------------------------------
# Kernel A: row-tiled GIN layers.  One grid step processes TN node rows:
#   agg_tile = A[tile, :] @ x          (bf16 MXU, f32 acc, layer-invariant)
#   h_{l+1}  = MLP_l(agg_tile + (1+eps_l) * h_l)    (elementwise in f32)
# and writes every layer output into its lane stripe of slab[tile, :].
# ----------------------------------------------------------------------------
def _gin_layers_kernel(eps1p_ref, a_ref, xfull_bf_ref, x_ref,
                       w1_ref, b1_ref, w2_ref, b2_ref, slab_ref,
                       *, num_mlp_layers, out_dim):
    bf16 = jnp.bfloat16
    D = out_dim

    # Hoisted neighborhood aggregation (layer-invariant, see module quirk).
    agg = jnp.dot(a_ref[...], xfull_bf_ref[...],
                  preferred_element_type=jnp.float32)

    h = x_ref[...]                      # f32 node-feature tile == h_0
    slab_ref[:, 0:D] = h                # direct stripe store (no concat)

    for l in range(num_mlp_layers):     # small static unroll over layers
        pooled = agg + eps1p_ref[l] * h                     # f32 VPU
        # GIN MLP (num_slp_layers = 2): Linear -> ReLU -> Linear
        z = jnp.dot(pooled.astype(bf16), w1_ref[l],
                    preferred_element_type=jnp.float32) + b1_ref[l]
        z = jnp.maximum(z, 0.0)                             # mlp_act_fun = ReLu
        h = jnp.dot(z.astype(bf16), w2_ref[l],
                    preferred_element_type=jnp.float32) + b2_ref[l]
        slab_ref[:, (l + 1) * D:(l + 2) * D] = h


# ----------------------------------------------------------------------------
# Kernel B: global-sum-pool + readout head.
#   merged = S @ slab accumulated over node tiles (f32 VMEM accumulator),
#   then lin1 -> ReLU -> dropout(identity) -> lin2 -> softmax at the last step.
# All four tiny head tensors are packed into ONE output slab.
# ----------------------------------------------------------------------------
def _readout_kernel(s_ref, slab_ref, lw1_ref, lb1_ref, lw2_ref, lb2_ref,
                    out_ref, acc_ref):
    bf16 = jnp.bfloat16
    k = pl.program_id(0)

    @pl.when(k == 0)
    def _init():
        acc_ref[...] = jnp.zeros_like(acc_ref)

    # Global sum pooling + per-graph layer concat in a single matmul:
    #   merged[b, l*D + d] = sum_n S[b, n] * h_l[n, d]
    acc_ref[...] += jnp.dot(s_ref[...], slab_ref[...].astype(bf16),
                            preferred_element_type=jnp.float32)

    @pl.when(k == pl.num_programs(0) - 1)
    def _finalize():
        merged = acc_ref[...]
        lin1 = jnp.dot(merged.astype(bf16), lw1_ref[...],
                       preferred_element_type=jnp.float32) + lb1_ref[...]
        lin1 = jnp.maximum(lin1, 0.0)          # lin_act_fun = ReLu
        # nn.Dropout is identity in eval mode.
        lin2 = jnp.dot(lin1.astype(bf16), lw2_ref[...],
                       preferred_element_type=jnp.float32) + lb2_ref[...]
        m = jnp.max(lin2, axis=1, keepdims=True)
        e = jnp.exp(lin2 - m)
        sm = e / jnp.sum(e, axis=1, keepdims=True)          # exact reciprocal
        out_ref[...] = jnp.concatenate([merged, lin1, lin2, sm], axis=1)


# ----------------------------------------------------------------------------
# Forward wrapper
# ----------------------------------------------------------------------------
def gin_forward(x, adj, batch_onehot, params, *, node_tile=512, pool_tile=1024):
    N, D = x.shape
    B = batch_onehot.shape[0]
    L = len(params["gin_layers"])
    H = params["gin_layers"][0]["w1"].shape[1]
    F_in = (L + 1) * D                         # = mlp_output_dim * (L+1)
    F_mid = params["lin1_w"].shape[1]          # = mlp_input_dim  * (L+1)
    C = params["lin2_w"].shape[1]
    F_out = F_in + F_mid + 2 * C               # packed head output width

    TN = N if N <= node_tile else node_tile
    TP = N if N <= pool_tile else pool_tile
    assert N % TN == 0 and N % TP == 0, "TODO(synk): ragged node tiles"

    bf16 = jnp.bfloat16
    adj_bf = adj.astype(bf16)                  # 0/1 entries -> exact in bf16
    x_bf = x.astype(bf16)
    s_bf = batch_onehot.astype(bf16)
    W1 = jnp.stack([p["w1"] for p in params["gin_layers"]]).astype(bf16)
    B1 = jnp.stack([p["b1"].reshape(1, -1) for p in params["gin_layers"]]
                   ).astype(jnp.float32)
    W2 = jnp.stack([p["w2"] for p in params["gin_layers"]]).astype(bf16)
    B2 = jnp.stack([p["b2"].reshape(1, -1) for p in params["gin_layers"]]
                   ).astype(jnp.float32)
    one_plus_eps = (1.0 + params["eps"]).astype(jnp.float32)

    # ---- Kernel A: node-row-tiled GIN layers -> slab [N, (L+1)*D] ----------
    kernel_a = functools.partial(_gin_layers_kernel,
                                 num_mlp_layers=L, out_dim=D)
    vmem_a = (2 * TN * N * 2            # adj tile, double-buffered, bf16
              + N * D * 2               # x full, bf16, resident
              + 2 * TN * D * 4          # x tile, f32, double-buffered
              + L * (D * H + H + H * D + D) * 4   # stacked MLP weights
              + 2 * TN * F_in * 4       # slab out tile, double-buffered
              + (4 << 20))              # headroom

    slab = pl.pallas_call(
        kernel_a,
        grid=(N // TN,),
        out_shape=jax.ShapeDtypeStruct((N, F_in), jnp.float32),
        in_specs=[
            pl.BlockSpec(memory_space=SMEM),                 # 1+eps       [L]
            pl.BlockSpec((TN, N), lambda i: (i, 0)),         # adj tile (bf16)
            pl.BlockSpec((N, D), lambda i: (0, 0)),          # x full   (bf16)
            pl.BlockSpec((TN, D), lambda i: (i, 0)),         # x tile   (f32)
            pl.BlockSpec((L, D, H), lambda i: (0, 0, 0)),    # W1       (bf16)
            pl.BlockSpec((L, 1, H), lambda i: (0, 0, 0)),    # B1       (f32)
            pl.BlockSpec((L, H, D), lambda i: (0, 0, 0)),    # W2       (bf16)
            pl.BlockSpec((L, 1, D), lambda i: (0, 0, 0)),    # B2       (f32)
        ],
        out_specs=pl.BlockSpec((TN, F_in), lambda i: (i, 0)),
        compiler_params=pltpu.CompilerParams(
            dimension_semantics=("parallel",),               # megacore on v7x
            vmem_limit_bytes=min(int(vmem_a), 128 * 1024 * 1024)),
    )(one_plus_eps, adj_bf, x_bf, x, W1, B1, W2, B2)

    # ---- Kernel B: pooling reduction over node tiles + readout head --------
    vmem_b = (2 * B * TP * 2 + 2 * TP * F_in * 4
              + F_in * F_mid * 2 + F_mid * C * 2 + (F_mid + C) * 4
              + B * F_in * 4 + 2 * B * F_out * 4 + (4 << 20))

    packed = pl.pallas_call(
        _readout_kernel,
        grid=(N // TP,),
        out_shape=jax.ShapeDtypeStruct((B, F_out), jnp.float32),
        in_specs=[
            pl.BlockSpec((B, TP), lambda k: (0, k)),         # S tile   (bf16)
            pl.BlockSpec((TP, F_in), lambda k: (k, 0)),      # slab tile (f32)
            pl.BlockSpec((F_in, F_mid), lambda k: (0, 0)),   # lin1_w   (bf16)
            pl.BlockSpec((1, F_mid), lambda k: (0, 0)),      # lin1_b   (f32)
            pl.BlockSpec((F_mid, C), lambda k: (0, 0)),      # lin2_w   (bf16)
            pl.BlockSpec((1, C), lambda k: (0, 0)),          # lin2_b   (f32)
        ],
        out_specs=pl.BlockSpec((B, F_out), lambda k: (0, 0)),
        scratch_shapes=[pltpu.VMEM((B, F_in), jnp.float32)], # merged accumulator
        compiler_params=pltpu.CompilerParams(
            dimension_semantics=("arbitrary",),              # reduction axis
            vmem_limit_bytes=min(int(vmem_b), 128 * 1024 * 1024)),
    )(s_bf, slab,
      params["lin1_w"].astype(bf16), params["lin1_b"].reshape(1, -1),
      params["lin2_w"].astype(bf16), params["lin2_b"].reshape(1, -1))

    # Cheap host-side views reconstructing the reference module's return tuple.
    merged = packed[:, :F_in]
    lin1_out = packed[:, F_in:F_in + F_mid]
    lin2_out = packed[:, F_in + F_mid:F_in + F_mid + C]
    softmaxed = packed[:, F_in + F_mid + C:]

    embeds = [slab[:, l * D:(l + 1) * D] for l in range(L + 1)]
    stacked = slab.reshape(N, L + 1, D).transpose(1, 0, 2)       # [L+1, N, D]
    pooled = merged.reshape(B, L + 1, D).transpose(1, 0, 2)      # [L+1, B, D]
    lin1_dropouted = lin1_out   # nn.Dropout is identity in eval mode
    return (embeds, stacked, pooled, merged, lin1_out, lin1_dropouted,
            lin2_out, softmaxed)


# ----------------------------------------------------------------------------
# Pure-JAX reference (mirrors the kernel's bf16-at-dot-inputs numerics)
# ----------------------------------------------------------------------------
def gin_forward_ref(x, adj, batch_onehot, params):
    bf16 = jnp.bfloat16

    def bdot(a, b):
        return jnp.dot(a.astype(bf16), b.astype(bf16),
                       preferred_element_type=jnp.float32)

    L = len(params["gin_layers"])
    agg = bdot(adj, x)
    embeds = [x]
    h = x
    for l in range(L):
        p = params["gin_layers"][l]
        pooled = agg + (1.0 + params["eps"][l]) * h
        z = jnp.maximum(bdot(pooled, p["w1"]) + p["b1"], 0.0)
        h = bdot(z, p["w2"]) + p["b2"]
        embeds.append(h)
    slab = jnp.concatenate(embeds, axis=1)
    merged = bdot(batch_onehot, slab)
    lin1 = jnp.maximum(bdot(merged, params["lin1_w"]) + params["lin1_b"], 0.0)
    lin2 = bdot(lin1, params["lin2_w"]) + params["lin2_b"]
    return jax.nn.softmax(lin2, axis=1)


def init_params(key, num_mlp_layers, mlp_input_dim, mlp_hid_dim,
                mlp_output_dim, num_classes):
    # Weight_Initializer = 3: normal(mean=0, std=0.1); Bias=True -> zeros.
    std = 0.1
    keys = jax.random.split(key, 2 * num_mlp_layers + 2)
    gin_layers = []
    for l in range(num_mlp_layers):
        w1 = std * jax.random.normal(keys[2 * l],
                                     (mlp_input_dim, mlp_hid_dim), jnp.float32)
        w2 = std * jax.random.normal(keys[2 * l + 1],
                                     (mlp_hid_dim, mlp_output_dim), jnp.float32)
        gin_layers.append(dict(w1=w1, b1=jnp.zeros((mlp_hid_dim,), jnp.float32),
                               w2=w2, b2=jnp.zeros((mlp_output_dim,), jnp.float32)))
    f_in = mlp_output_dim * (num_mlp_layers + 1)
    f_mid = mlp_input_dim * (num_mlp_layers + 1)
    lin1_w = std * jax.random.normal(keys[-2], (f_in, f_mid), jnp.float32)
    lin2_w = std * jax.random.normal(keys[-1], (f_mid, num_classes), jnp.float32)
    return dict(
        eps=jnp.zeros((num_mlp_layers,), jnp.float32),
        gin_layers=gin_layers,
        lin1_w=lin1_w, lin1_b=jnp.zeros((f_mid,), jnp.float32),
        lin2_w=lin2_w, lin2_b=jnp.zeros((num_classes,), jnp.float32),
    )


if __name__ == "__main__":
    # Small deterministic config
    num_mlp_layers = 2     # L
    mlp_input_dim = 8      # D (== mlp_output_dim so layer stacking type-checks)
    mlp_output_dim = 8
    mlp_hid_dim = 16
    num_classes = 4
    N = 16                 # total nodes
    B = 2                  # graphs in the batch (8 nodes each)

    key = jax.random.PRNGKey(0)
    k_adj, k_x, k_params = jax.random.split(key, 3)

    # graph assignment + one-hot pooling matrix S [B, N]
    batch = jnp.repeat(jnp.arange(B), N // B)
    batch_onehot = (jnp.arange(B)[:, None] == batch[None, :]).astype(jnp.float32)

    # dense block-diagonal random adjacency (like to_scipy_sparse_matrix().todense())
    rand_edges = jax.random.bernoulli(k_adj, 0.3, (N, N)).astype(jnp.float32)
    block_mask = (batch[:, None] == batch[None, :]).astype(jnp.float32)
    adj = rand_edges * block_mask

    # node features
    x = jax.random.normal(k_x, (N, mlp_input_dim), jnp.float32)

    params = init_params(k_params, num_mlp_layers, mlp_input_dim,
                         mlp_hid_dim, mlp_output_dim, num_classes)

    outs = gin_forward(x, adj, batch_onehot, params)
    outs = jax.block_until_ready(outs)
    softmaxed = outs[-1]

    ref_softmax = gin_forward_ref(x, adj, batch_onehot, params)

    assert softmaxed.shape == (B, num_classes)
    assert bool(jnp.all(jnp.isfinite(softmaxed)))
    assert bool(jnp.allclose(jnp.sum(softmaxed, axis=1), 1.0, atol=1e-4))
    assert bool(jnp.allclose(softmaxed, ref_softmax, atol=2e-3, rtol=2e-3))
    print("KERNEL_OK")
</pallas_src>

<mosaic_0001>
module attributes {stable_mosaic.version = 11 : i64} {
  func.func @_gin_layers_kernel(%arg0: i32, %arg1: memref<2xf32, #tpu.memory_space<smem>>, %arg2: memref<16x16xbf16, #tpu.memory_space<vmem>>, %arg3: memref<16x8xbf16, #tpu.memory_space<vmem>>, %arg4: memref<16x8xf32, #tpu.memory_space<vmem>>, %arg5: memref<2x8x16xbf16, #tpu.memory_space<vmem>>, %arg6: memref<2x1x16xf32, #tpu.memory_space<vmem>>, %arg7: memref<2x16x8xbf16, #tpu.memory_space<vmem>>, %arg8: memref<2x1x8xf32, #tpu.memory_space<vmem>>, %arg9: memref<16x24xf32, #tpu.memory_space<vmem>>) attributes {dimension_semantics = [#tpu.dimension_semantics<parallel>], iteration_bounds = array<i64: 1>, scalar_prefetch = 0 : i64, scratch_operands = 0 : i64, tpu.core_type = #tpu.core_type<tc>, window_params = [{transform_indices = @transform_0, window_bounds = array<i64: 2>}, {transform_indices = @transform_1, window_bounds = array<i64: 16, 16>}, {pipeline_mode = #tpu.pipeline_mode<synchronous>, transform_indices = @transform_2, window_bounds = array<i64: 16, 8>}, {transform_indices = @transform_3, window_bounds = array<i64: 16, 8>}, {pipeline_mode = #tpu.pipeline_mode<synchronous>, transform_indices = @transform_4, window_bounds = array<i64: 2, 8, 16>}, {pipeline_mode = #tpu.pipeline_mode<synchronous>, transform_indices = @transform_5, window_bounds = array<i64: 2, 1, 16>}, {pipeline_mode = #tpu.pipeline_mode<synchronous>, transform_indices = @transform_6, window_bounds = array<i64: 2, 16, 8>}, {pipeline_mode = #tpu.pipeline_mode<synchronous>, transform_indices = @transform_7, window_bounds = array<i64: 2, 1, 8>}, {transform_indices = @transform_8, window_bounds = array<i64: 16, 24>}]} {
    %c0 = arith.constant 0 : index
    %c0_0 = arith.constant 0 : index
    %0 = vector.load %arg2[%c0, %c0_0] : memref<16x16xbf16, #tpu.memory_space<vmem>>, vector<16x16xbf16>
    %c0_1 = arith.constant 0 : index
    %c0_2 = arith.constant 0 : index
    %1 = vector.load %arg3[%c0_1, %c0_2] : memref<16x8xbf16, #tpu.memory_space<vmem>>, vector<16x8xbf16>
    %cst = arith.constant dense<0.000000e+00> : vector<16x8xf32>
    %2 = tpu.matmul %0, %1, %cst {dimension_numbers = #tpu.dot_dimension_numbers<[1], [0], [0], [1], [0, 0, 1, 1], [], []>} : vector<16x16xbf16>, vector<16x8xbf16>, vector<16x8xf32> -> vector<16x8xf32>
    %c0_3 = arith.constant 0 : index
    %c0_4 = arith.constant 0 : index
    %3 = vector.load %arg4[%c0_3, %c0_4] : memref<16x8xf32, #tpu.memory_space<vmem>>, vector<16x8xf32>
    %c0_5 = arith.constant 0 : index
    %c0_6 = arith.constant 0 : index
    %4 = vector.load %arg9[%c0_5, %c0_6] : memref<16x24xf32, #tpu.memory_space<vmem>>, vector<16x8xf32>
    tpu.vector_store %arg9[%c0_5, %c0_6], %3 {strides = array<i32>} : memref<16x24xf32, #tpu.memory_space<vmem>>, vector<16x8xf32>,
    %c0_7 = arith.constant 0 : index
    %5 = memref.load %arg1[%c0_7] : memref<2xf32, #tpu.memory_space<smem>>
    %6 = vector.broadcast %5 : f32 to vector<16x8xf32>
    %7 = arith.mulf %6, %3 : vector<16x8xf32>
    %8 = arith.addf %2, %7 : vector<16x8xf32>
    %9 = arith.truncf %8 : vector<16x8xf32> to vector<16x8xbf16>
    %c0_8 = arith.constant 0 : index
    %c0_9 = arith.constant 0 : index
    %c0_10 = arith.constant 0 : index
    %10 = vector.load %arg5[%c0_8, %c0_9, %c0_10] : memref<2x8x16xbf16, #tpu.memory_space<vmem>>, vector<1x8x16xbf16>
    %11 = vector.shape_cast %10 : vector<1x8x16xbf16> to vector<8x16xbf16>
    %cst_11 = arith.constant dense<0.000000e+00> : vector<16x16xf32>
    %12 = tpu.matmul %9, %11, %cst_11 {dimension_numbers = #tpu.dot_dimension_numbers<[1], [0], [0], [1], [0, 0, 1, 1], [], []>} : vector<16x8xbf16>, vector<8x16xbf16>, vector<16x16xf32> -> vector<16x16xf32>
    %c0_12 = arith.constant 0 : index
    %c0_13 = arith.constant 0 : index
    %c0_14 = arith.constant 0 : index
    %13 = vector.load %arg6[%c0_12, %c0_13, %c0_14] : memref<2x1x16xf32, #tpu.memory_space<vmem>>, vector<1x1x16xf32>
    %14 = vector.shape_cast %13 : vector<1x1x16xf32> to vector<1x16xf32>
    %15 = vector.broadcast %14 : vector<1x16xf32> to vector<16x16xf32>
    %16 = arith.addf %12, %15 : vector<16x16xf32>
    %cst_15 = arith.constant 0.000000e+00 : f32
    %17 = vector.broadcast %cst_15 : f32 to vector<16x16xf32>
    %18 = arith.maximumf %16, %17 : vector<16x16xf32>
    %19 = arith.truncf %18 : vector<16x16xf32> to vector<16x16xbf16>
    %c0_16 = arith.constant 0 : index
    %c0_17 = arith.constant 0 : index
    %c0_18 = arith.constant 0 : index
    %20 = vector.load %arg7[%c0_16, %c0_17, %c0_18] : memref<2x16x8xbf16, #tpu.memory_space<vmem>>, vector<1x16x8xbf16>
    %21 = vector.shape_cast %20 : vector<1x16x8xbf16> to vector<16x8xbf16>
    %cst_19 = arith.constant dense<0.000000e+00> : vector<16x8xf32>
    %22 = tpu.matmul %19, %21, %cst_19 {dimension_numbers = #tpu.dot_dimension_numbers<[1], [0], [0], [1], [0, 0, 1, 1], [], []>} : vector<16x16xbf16>, vector<16x8xbf16>, vector<16x8xf32> -> vector<16x8xf32>
    %c0_20 = arith.constant 0 : index
    %c0_21 = arith.constant 0 : index
    %c0_22 = arith.constant 0 : index
    %23 = vector.load %arg8[%c0_20, %c0_21, %c0_22] : memref<2x1x8xf32, #tpu.memory_space<vmem>>, vector<1x1x8xf32>
    %24 = vector.shape_cast %23 : vector<1x1x8xf32> to vector<1x8xf32>
    %25 = vector.broadcast %24 : vector<1x8xf32> to vector<16x8xf32>
    %26 = arith.addf %22, %25 : vector<16x8xf32>
    %c0_23 = arith.constant 0 : index
    %c8 = arith.constant 8 : index
    %27 = vector.load %arg9[%c0_23, %c8] : memref<16x24xf32, #tpu.memory_space<vmem>>, vector<16x8xf32>
    tpu.vector_store %arg9[%c0_23, %c8], %26 {strides = array<i32>} : memref<16x24xf32, #tpu.memory_space<vmem>>, vector<16x8xf32>,
    %c1 = arith.constant 1 : index
    %28 = memref.load %arg1[%c1] : memref<2xf32, #tpu.memory_space<smem>>
    %29 = vector.broadcast %28 : f32 to vector<16x8xf32>
    %30 = arith.mulf %29, %26 : vector<16x8xf32>
    %31 = arith.addf %2, %30 : vector<16x8xf32>
    %32 = arith.truncf %31 : vector<16x8xf32> to vector<16x8xbf16>
    %c1_24 = arith.constant 1 : index
    %c0_25 = arith.constant 0 : index
    %c0_26 = arith.constant 0 : index
    %33 = vector.load %arg5[%c1_24, %c0_25, %c0_26] : memref<2x8x16xbf16, #tpu.memory_space<vmem>>, vector<1x8x16xbf16>
    %34 = vector.shape_cast %33 : vector<1x8x16xbf16> to vector<8x16xbf16>
    %cst_27 = arith.constant dense<0.000000e+00> : vector<16x16xf32>
    %35 = tpu.matmul %32, %34, %cst_27 {dimension_numbers = #tpu.dot_dimension_numbers<[1], [0], [0], [1], [0, 0, 1, 1], [], []>} : vector<16x8xbf16>, vector<8x16xbf16>, vector<16x16xf32> -> vector<16x16xf32>
    %c1_28 = arith.constant 1 : index
    %c0_29 = arith.constant 0 : index
    %c0_30 = arith.constant 0 : index
    %36 = vector.load %arg6[%c1_28, %c0_29, %c0_30] : memref<2x1x16xf32, #tpu.memory_space<vmem>>, vector<1x1x16xf32>
    %37 = vector.shape_cast %36 : vector<1x1x16xf32> to vector<1x16xf32>
    %38 = vector.broadcast %37 : vector<1x16xf32> to vector<16x16xf32>
    %39 = arith.addf %35, %38 : vector<16x16xf32>
    %cst_31 = arith.constant 0.000000e+00 : f32
    %40 = vector.broadcast %cst_31 : f32 to vector<16x16xf32>
    %41 = arith.maximumf %39, %40 : vector<16x16xf32>
    %42 = arith.truncf %41 : vector<16x16xf32> to vector<16x16xbf16>
    %c1_32 = arith.constant 1 : index
    %c0_33 = arith.constant 0 : index
    %c0_34 = arith.constant 0 : index
    %43 = vector.load %arg7[%c1_32, %c0_33, %c0_34] : memref<2x16x8xbf16, #tpu.memory_space<vmem>>, vector<1x16x8xbf16>
    %44 = vector.shape_cast %43 : vector<1x16x8xbf16> to vector<16x8xbf16>
    %cst_35 = arith.constant dense<0.000000e+00> : vector<16x8xf32>
    %45 = tpu.matmul %42, %44, %cst_35 {dimension_numbers = #tpu.dot_dimension_numbers<[1], [0], [0], [1], [0, 0, 1, 1], [], []>} : vector<16x16xbf16>, vector<16x8xbf16>, vector<16x8xf32> -> vector<16x8xf32>
    %c1_36 = arith.constant 1 : index
    %c0_37 = arith.constant 0 : index
    %c0_38 = arith.constant 0 : index
    %46 = vector.load %arg8[%c1_36, %c0_37, %c0_38] : memref<2x1x8xf32, #tpu.memory_space<vmem>>, vector<1x1x8xf32>
    %47 = vector.shape_cast %46 : vector<1x1x8xf32> to vector<1x8xf32>
    %48 = vector.broadcast %47 : vector<1x8xf32> to vector<16x8xf32>
    %49 = arith.addf %45, %48 : vector<16x8xf32>
    %c0_39 = arith.constant 0 : index
    %c16 = arith.constant 16 : index
    %50 = vector.load %arg9[%c0_39, %c16] : memref<16x24xf32, #tpu.memory_space<vmem>>, vector<16x8xf32>
    tpu.vector_store %arg9[%c0_39, %c16], %49 {strides = array<i32>} : memref<16x24xf32, #tpu.memory_space<vmem>>, vector<16x8xf32>,
    return
  }
  func.func @transform_0(%arg0: i32) -> i32 {
    %c0_i32 = arith.constant 0 : i32
    %c0_i32_0 = arith.constant 0 : i32
    return %c0_i32 : i32
  }
  func.func @transform_1(%arg0: i32) -> (i32, i32) {
    %c0_i32 = arith.constant 0 : i32
    %c0_i32_0 = arith.constant 0 : i32
    return %arg0, %c0_i32 : i32, i32
  }
  func.func @transform_2(%arg0: i32) -> (i32, i32) {
    %c0_i32 = arith.constant 0 : i32
    %c0_i32_0 = arith.constant 0 : i32
    %c0_i32_1 = arith.constant 0 : i32
    return %c0_i32, %c0_i32_0 : i32, i32
  }
  func.func @transform_3(%arg0: i32) -> (i32, i32) {
    %c0_i32 = arith.constant 0 : i32
    %c0_i32_0 = arith.constant 0 : i32
    return %arg0, %c0_i32 : i32, i32
  }
  func.func @transform_4(%arg0: i32) -> (i32, i32, i32) {
    %c0_i32 = arith.constant 0 : i32
    %c0_i32_0 = arith.constant 0 : i32
    %c0_i32_1 = arith.constant 0 : i32
    %c0_i32_2 = arith.constant 0 : i32
    return %c0_i32, %c0_i32_0, %c0_i32_1 : i32, i32, i32
  }
  func.func @transform_5(%arg0: i32) -> (i32, i32, i32) {
    %c0_i32 = arith.constant 0 : i32
    %c0_i32_0 = arith.constant 0 : i32
    %c0_i32_1 = arith.constant 0 : i32
    %c0_i32_2 = arith.constant 0 : i32
    return %c0_i32, %c0_i32_0, %c0_i32_1 : i32, i32, i32
  }
  func.func @transform_6(%arg0: i32) -> (i32, i32, i32) {
    %c0_i32 = arith.constant 0 : i32
    %c0_i32_0 = arith.constant 0 : i32
    %c0_i32_1 = arith.constant 0 : i32
    %c0_i32_2 = arith.constant 0 : i32
    return %c0_i32, %c0_i32_0, %c0_i32_1 : i32, i32, i32
  }
  func.func @transform_7(%arg0: i32) -> (i32, i32, i32) {
    %c0_i32 = arith.constant 0 : i32
    %c0_i32_0 = arith.constant 0 : i32
    %c0_i32_1 = arith.constant 0 : i32
    %c0_i32_2 = arith.constant 0 : i32
    return %c0_i32, %c0_i32_0, %c0_i32_1 : i32, i32, i32
  }
  func.func @transform_8(%arg0: i32) -> (i32, i32) {
    %c0_i32 = arith.constant 0 : i32
    %c0_i32_0 = arith.constant 0 : i32
    return %arg0, %c0_i32 : i32, i32
  }
}

</mosaic_0001>

<bundles_post_ra>
// kernel: tpu_custom_call.1
= control target key start
LH: loop header
LB: loop body
LE: loop exit
PB: predicated region body
PF: predicated region fallthrough
CT: control target
= control target key end

     0   :  { %13 = vsyncpa [#allocation4], 0  ;;  %s618_s0 = inlined_call_operand.vmem [shape: f32[2], index: 0, kind: input, shape index: {}]   ;;  %s619_s1 = inlined_call_operand.vmem [shape: bf16[16,16], index: 1, kind: input, shape index: {}]   ;;  %s620_s2 = inlined_call_operand.vmem [shape: bf16[16,8], index: 2, kind: input, shape index: {}]   ;;  %s621_s3 = inlined_call_operand.vmem [shape: f32[16,8], index: 3, kind: input, shape index: {}]   ;;  %s622_s4 = inlined_call_operand.vmem [shape: bf16[2,8,16], index: 4, kind: input, shape index: {}]   ;;  %s623_s5 = inlined_call_operand.vmem [shape: f32[2,1,16], index: 5, kind: input, shape index: {}]   ;;  %s624_s6 = inlined_call_operand.vmem [shape: bf16[2,16,8], index: 6, kind: input, shape index: {}]   ;;  %s625_s7 = inlined_call_operand.vmem [shape: f32[2,1,8], index: 7, kind: input, shape index: {}]   ;;  %s626_s8 = inlined_call_operand.hbm [shape: f32[16,24], index: 8, kind: output, shape index: {}]  }
   0x1   :  { %14 = vsyncpa [#allocation3], 0  ;;  %s21_s29 = sshll.u32 %s618_s0, 4  ;;  %s22_s29 = int_to_ptr.vmem [resolvable:$true] %s21_s29 }
   0x2   :  { %s471_s30 = scalar_lea.vmem %s22_s29, 16  ;;  %p476_p1 = scmp.lt.s32.totalorder %s22_s29, %s22_s29 }
   0x3   :  { %p472_p0 = scmp.ne.s32.totalorder %s22_s29, %s471_s30  ;;  %p477_p2 = scmp.lt.s32.totalorder %s471_s30, %s471_s30 }
   0x5   :  { %p478_p3 = por %p477_p2, %p476_p1 }
   0x7   :  { %p479_p4 = pnand %p478_p3, %p472_p0 }
   0x9   :  { %482 = shalt.err (!%p479_p4)
}
   0xa   :  { %s507_s9 = smov [#allocation2]  }
   0xb   :  { %24 = dma.vmem_to_smem %s22_s29, 16, %s507_s9, [#allocation4]  }
   0xc   :  { %503 = dma.done.wait [#allocation4], 16  }
   0xd   :  { %504 = vsyncadd [#allocation4], 4294967280 }
   0xe   :  { %42 = sfence }
   0xf   :  { %v467_v0 = vld [vmem:[%s620_s2] sm:$0xff]   ;;  %v508_v1 = vmov 0.0   ;;  %vm509_vm0 = vmmov 0   ;;  %vm59_vm1 = vcmask 130048   ;;  %vm127_vm2 = vcmask 1043456   ;;  %v105_v6 = vld [vmem:[%s621_s3 + $0x8] sm:$0xff] }
  0x10   :  { %430 = vmatprep.subr.bf16.mxu0 %v508_v1  ;;  %v468_v2 = vld [vmem:[%s619_s1] sm:$0xff]   ;;  %436 = vmatprep.subr.bf16.mxu1 %v508_v1  ;;  %vm106_vm3 = vcmask 64512   ;;  %s109_s17 = sld [smem:[#allocation2]]  ;;  %s510_s25 = smov 8   ;;  %v470_v43 = vld [vmem:[%s624_s6 + $0x8] sm:$0xff]   ;;  %vm242_vm4 = vcmask 130112  }
  0x11   :  { %431 = vmatpush3.bf16.msra.mxu0 %v467_v0  ;;  %432 = vmatprep.mubr.msk.bf16.mxu0 %vm509_vm0, %v508_v1  ;;  %v116_v3 = vld [vmem:[%s622_s4] sm:$0xf]  ;;  %108 = vst.msk [vmem:[#allocation5 + $0x8] sm:$0xff] %vm106_vm3, %v105_v6  ;;  %v410_v13 = vld [vmem:[%s622_s4 + $0x4] sm:$0xf]  ;;  %s409_s4 = sld [smem:[#allocation2 + $0x1]] }
  0x12   :  { %438 = vmatprep.mubr.msk.bf16.mxu1 %vm509_vm0, %v508_v1  ;;  %442 = vmatprep.subr.bf16.mxu0 %v508_v1  ;;  %v129_v4 = vsel %vm127_vm2, %v116_v3, 0  ;;  %v104_v5 = vld [vmem:[%s621_s3] sm:$0xff]  ;;  %v266_v18 = vsel %vm127_vm2, %v410_v13, 0  ;;  %s511_s9 = smov 16   ;;  %vm381_vm5 = vcmask 195712  }
  0x13   :  { %437 = vmatpush3.bf16.msra.mxu1 %v129_v4  ;;  %107 = vst.msk [vmem:[#allocation5] sm:$0xff] %vm106_vm3, %v104_v5  ;;  %v469_v19 = vld [vmem:[%s624_s6] sm:$0xff]  }
  0x14   :  { %433 = vmatmul.mubr.msk.bf16.vlgmr.msra.gmra.mxu0 %vm59_vm1, %v468_v2  ;;  %448 = vmatprep.subr.bf16.mxu1 %v508_v1  ;;  %v404_v20 = vld [vmem:[%s623_s5] ss:$0 sm:$0xff]  ;;  %v412_v46 = vld [vmem:[%s623_s5 + $0x1] ss:$0 sm:$0xff]  ;;  %s512_s5 = smov [#allocation5]  }
  0x15   :  { %444 = vmatprep.mubr.msk.bf16.mxu0 %vm509_vm0, %v508_v1  ;;  %443 = vmatpush3.bf16.msra.mxu0 %v469_v19  ;;  %v406_v30 = vld [vmem:[%s625_s7] ss:$0 sm:$0xff]  ;;  %v417_v56 = vld [vmem:[%s625_s7 + $0x1] ss:$0 sm:$0xff]  ;;  %s389_s10 = sshll.u32 %s512_s5, 4  ;;  %s390_s10 = int_to_ptr.vmem [resolvable:$true] %s389_s10 }
  0x16   :  { %v110_v7 = vstv %s109_s17  ;;  %454 = vmatprep.subr.bf16.mxu0 %v508_v1  ;;  %s483_s11 = scalar_lea.vmem %s390_s10, 256  ;;  %p488_p6 = scmp.lt.s32.totalorder %s390_s10, %s390_s10 }
  0x17   :  { %v111_v9 = vmul.f32 %v110_v7, %v104_v5  ;;  %v112_v10 = vmul.f32 %v110_v7, %v105_v6  ;;  %v246_v33 = vstv %s409_s4  ;;  %p484_p5 = scmp.ne.s32.totalorder %s390_s10, %s483_s11  ;;  %p489_p7 = scmp.lt.s32.totalorder %s483_s11, %s483_s11 }
  0x19   :  { %p490_p8 = por %p489_p7, %p488_p6 }
  0x1b   :  { %p491_p9 = pnand %p490_p8, %p484_p5 }
  0xd4   :  { %v97_v8 = vpop.f32.mrf.mxu0 }
  0xd5   :  { %v113_v14 = vadd.f32 %v111_v9, %v97_v8 }
  0xd6   :  { %v434_v11 = vpop.f32.mrf.mxu0 }
  0xd8   :  { %v100_v12 = vpop.f32.mrf.mxu0 }
  0xd9   :  { %v114_v15 = vadd.f32 %v112_v10, %v100_v12 }
  0xda   :  { %v435_v16 = vpop.f32.mrf.mxu0 }
  0xdb   :  { %v115_v17 = vpack.c.bf16 %v114_v15, %v113_v14 }
  0xdd   :  { %439 = vmatmul.mubr.msk.bf16.vlgmr.msra.gmra.mxu1 %vm106_vm3, %v115_v17 }
  0xde   :  { %449 = vmatpush3.bf16.msra.mxu1 %v266_v18  ;;  %450 = vmatprep.mubr.msk.bf16.mxu1 %vm509_vm0, %v508_v1 }
 0x19d   :  { %v165_v21 = vpop.f32.mrf.mxu1 }
 0x19e   :  { %v166_v23 = vadd.f32 %v404_v20, %v165_v21 }
 0x19f   :  { %v440_v22 = vpop.f32.mrf.mxu1 }
 0x1a0   :  { %v172_v27 = vmax.f32 %v166_v23, 0.0 }
 0x1a1   :  { %v168_v24 = vpop.f32.mrf.mxu1 }
 0x1a2   :  { %v169_v25 = vadd.f32 %v404_v20, %v168_v24 }
 0x1a3   :  { %v441_v26 = vpop.f32.mrf.mxu1 }
 0x1a4   :  { %v173_v28 = vmax.f32 %v169_v25, 0.0 }
 0x1a6   :  { %v174_v29 = vpack.c.bf16 %v173_v28, %v172_v27 }
 0x1a8   :  { %445 = vmatmul.mubr.msk.bf16.vlgmr.msra.gmra.mxu0 %vm59_vm1, %v174_v29 }
 0x1a9   :  { %456 = vmatprep.mubr.msk.bf16.mxu0 %vm509_vm0, %v508_v1  ;;  %455 = vmatpush3.bf16.msra.mxu0 %v470_v43 }
 0x268   :  { %v227_v31 = vpop.f32.mrf.mxu0 }
 0x269   :  { %v228_v32 = vadd.f32 %v406_v30, %v227_v31 }
 0x26a   :  { %v446_v34 = vpop.f32.mrf.mxu0 }
 0x26b   :  { %236 = vrot.lane.b32.xlu0 %v228_v32, %s510_s25  ;;  %v247_v36 = vmul.f32 %v246_v33, %v228_v32 }
 0x26c   :  { %v230_v35 = vpop.f32.mrf.mxu0 }
 0x26d   :  { %v231_v37 = vadd.f32 %v406_v30, %v230_v35  ;;  %v249_v40 = vadd.f32 %v247_v36, %v97_v8 }
 0x26e   :  { %v447_v38 = vpop.f32.mrf.mxu0 }
 0x26f   :  { %v248_v39 = vmul.f32 %v246_v33, %v231_v37  ;;  %238 = vrot.lane.b32.xlu0 %v231_v37, %s510_s25 }
 0x271   :  { %v250_v41 = vadd.f32 %v248_v39, %v100_v12 }
 0x273   :  { %v251_v42 = vpack.c.bf16 %v250_v41, %v249_v40 }
 0x275   :  { %451 = vmatmul.mubr.msk.bf16.vlgmr.msra.gmra.mxu1 %vm106_vm3, %v251_v42 }
 0x2dd   :  { %v237_v44 = vpop.permute.xlu0 %236 }
 0x2de   :  { %243 = vst.msk [vmem:[#allocation5] sm:$0xff] %vm242_vm4, %v237_v44 }
 0x2e1   :  { %v239_v45 = vpop.permute.xlu0 %238 }
 0x2e2   :  { %244 = vst.msk [vmem:[#allocation5 + $0x8] sm:$0xff] %vm242_vm4, %v239_v45 }
 0x335   :  { %v302_v47 = vpop.f32.mrf.mxu1 }
 0x336   :  { %v303_v49 = vadd.f32 %v412_v46, %v302_v47 }
 0x337   :  { %v452_v48 = vpop.f32.mrf.mxu1 }
 0x338   :  { %v309_v53 = vmax.f32 %v303_v49, 0.0 }
 0x339   :  { %v305_v50 = vpop.f32.mrf.mxu1 }
 0x33a   :  { %v306_v51 = vadd.f32 %v412_v46, %v305_v50 }
 0x33b   :  { %v453_v52 = vpop.f32.mrf.mxu1 }
 0x33c   :  { %v310_v54 = vmax.f32 %v306_v51, 0.0 }
 0x33e   :  { %v311_v55 = vpack.c.bf16 %v310_v54, %v309_v53 }
 0x340   :  { %457 = vmatmul.mubr.msk.bf16.vlgmr.msra.gmra.mxu0 %vm59_vm1, %v311_v55 }
 0x400   :  { %v366_v57 = vpop.f32.mrf.mxu0 }
 0x401   :  { %v367_v58 = vadd.f32 %v417_v56, %v366_v57 }
 0x402   :  { %v458_v59 = vpop.f32.mrf.mxu0 }
 0x403   :  { %375 = vrot.lane.b32.xlu1 %v367_v58, %s511_s9 }
 0x404   :  { %v369_v60 = vpop.f32.mrf.mxu0 }
 0x405   :  { %v370_v61 = vadd.f32 %v417_v56, %v369_v60 }
 0x406   :  { %v459_v62 = vpop.f32.mrf.mxu0 }
 0x407   :  { %377 = vrot.lane.b32.xlu1 %v370_v61, %s511_s9 }
 0x475   :  { %v376_v63 = vpop.permute.xlu1 %375 }
 0x476   :  { %382 = vst.msk [vmem:[#allocation5] sm:$0xff] %vm381_vm5, %v376_v63 }
 0x479   :  { %v378_v0 = vpop.permute.xlu1 %377 }
 0x47a   :  { %383 = vst.msk [vmem:[#allocation5 + $0x8] sm:$0xff] %vm381_vm5, %v378_v0 }
 0x47b   :  { %494 = shalt.err (!%p491_p9)
}
 0x47c   :  { %s513_s7 = smov 128  }
 0x47d   :  { %395 = dma.vmem_to_hbm [thread:$0]  %s390_s10, 256, %s626_s8, [#allocation3], %s513_s7, %s513_s7, %s510_s25  }
 0x47e   :  { %505 = dma.done.wait [#allocation3], 256  }
 0x47f   :  { %506 = vsyncadd [#allocation3], 4294967040 }
 0x480   :  { %399 = vsyncpa [#allocation3], 1 }
 0x481   :  { %400 = vsyncpa [#allocation4], 1 }

</bundles_post_ra>
